<compile_context>
chip_gen: v5e
topology: v5e:2x2
jax: 0.10.0
libtpu: 0.0.40
codegen_flags: <defaults>
</compile_context>

<pallas_src>
import functools

import jax
import jax.numpy as jnp
from jax.experimental import pallas as pl
from jax.experimental.pallas import tpu as pltpu


_MASK = -1e30  # logits value for padded vocab lanes (finite, exp underflows to 0)


def _round_up(n, m):
    return ((n + m - 1) // m) * m


def _default_vmem_budget():
    # Per-TensorCore budget used to choose flat-vs-vtile and tm. v7x has only
    # 64 MiB/TC (and 2 TCs share a chip), so stay conservative when we cannot
    # query the hardware.
    try:
        cap = int(pltpu.get_tpu_info().vmem_capacity_bytes)
        return max(24 << 20, (cap * 3) // 5)
    except Exception:
        return 40 << 20


def _flat_vmem_bytes(tm, d, v, x_item, w_item, out_item, single_buffer):
    wb = 1 if single_buffer else 2
    const = wb * (d * v * w_item + v * 4 + 2 * d * 4)       # weight + bias + ln params
    stream = 2 * tm * d * x_item + 2 * tm * v * out_item    # double-buffered x / out
    temps = 3 * tm * v * 4                                  # f32 logits / exp temporaries
    return const + stream + temps


def _vtiled_vmem_bytes(tm, tv, d, x_item, w_item, out_item):
    wtiles = 2 * (d * tv + tv) * w_item                     # streamed weight + bias tiles
    stream = 2 * tm * d * x_item + 2 * tm * tv * out_item
    scratch = tm * d * w_item + 2 * tm * 4                  # xn cache + running m / l
    temps = 3 * tm * tv * 4
    return wtiles + stream + scratch + temps


# ---------------------------------------------------------------------------
# Flat kernel: whole (padded) vocab resident per row tile.
# ---------------------------------------------------------------------------
def _generator_flat_kernel(x_ref, w_ref, b_ref, g_ref, beta_ref, o_ref, *,
                           inv_T, eps, add_norm):
    # x_ref   : (TM, D)     row tile of inputs
    # w_ref   : (D, Vp)     projection weight (native dtype, single-buffered)
    # b_ref   : (1, Vp)     bias, pre-scaled by 1/T, padded lanes = _MASK
    # g_ref   : (1, D)      LayerNorm scale, pre-scaled by 1/T
    # beta_ref: (1, D)      LayerNorm shift, pre-scaled by 1/T
    # o_ref   : (TM, Vp)    log-probs
    w = w_ref[...]                              # native dtype -> fast MXU path
    b = b_ref[...].astype(jnp.float32)          # converted once (hoisted)

    if add_norm:
        x = x_ref[...].astype(jnp.float32)
        g = g_ref[...].astype(jnp.float32)
        bt = beta_ref[...].astype(jnp.float32)
        # Annotated-transformer LayerNorm: a_2 * (x - mean)/(std + eps) + b_2
        # (unbiased sample std, matching torch.Tensor.std default).
        d = x.shape[-1]
        mean = jnp.mean(x, axis=-1, keepdims=True)
        centered = x - mean
        var_unb = jnp.sum(centered * centered, axis=-1, keepdims=True) * (1.0 / (d - 1))
        inv_std = pl.reciprocal(jnp.sqrt(var_unb) + eps, approx=False)
        x_mm = (g * centered * inv_std + bt).astype(w.dtype)
    else:
        if inv_T != 1.0:
            # D-wide scale (much narrower than scaling the (TM, V) logits).
            x_mm = (x_ref[...].astype(jnp.float32) * inv_T).astype(w.dtype)
        else:
            x_mm = x_ref[...].astype(w.dtype)

    logits = jnp.dot(x_mm, w, preferred_element_type=jnp.float32) + b

    # Numerically stable log-softmax over the vocab (lane) dim, f32 throughout.
    m = jnp.max(logits, axis=-1, keepdims=True)
    shifted = logits - m
    lse = jnp.log(jnp.sum(jnp.exp(shifted), axis=-1, keepdims=True))
    o_ref[...] = (shifted - lse).astype(o_ref.dtype)


# ---------------------------------------------------------------------------
# V-tiled two-pass kernel: grid = (row tiles, pass in {0,1}, V tiles).
# Pass 0 streams the weight tiles and accumulates the online max / sum-exp;
# pass 1 recomputes the logits tile and writes log-probs.  The output
# index_map collapses to block (i, 0) during pass 0, so every output block's
# visits are consecutive and only correct data is ever written back to HBM.
# ---------------------------------------------------------------------------
def _generator_vtiled_kernel(x_ref, w_ref, b_ref, g_ref, beta_ref, o_ref,
                             xn_ref, m_ref, l_ref, *, inv_T, eps, add_norm):
    p = pl.program_id(1)   # 0: statistics pass, 1: write pass
    j = pl.program_id(2)   # vocab tile

    @pl.when(jnp.logical_and(p == 0, j == 0))
    def _():
        # Normalize / scale the row tile once per i and cache it in MXU dtype.
        if add_norm:
            x = x_ref[...].astype(jnp.float32)
            g = g_ref[...].astype(jnp.float32)
            bt = beta_ref[...].astype(jnp.float32)
            d = x.shape[-1]
            mean = jnp.mean(x, axis=-1, keepdims=True)
            centered = x - mean
            var_unb = jnp.sum(centered * centered, axis=-1, keepdims=True) * (1.0 / (d - 1))
            inv_std = pl.reciprocal(jnp.sqrt(var_unb) + eps, approx=False)
            xn_ref[...] = (g * centered * inv_std + bt).astype(xn_ref.dtype)
        else:
            if inv_T != 1.0:
                xn_ref[...] = (x_ref[...].astype(jnp.float32) * inv_T).astype(xn_ref.dtype)
            else:
                xn_ref[...] = x_ref[...].astype(xn_ref.dtype)
        m_ref[...] = jnp.full_like(m_ref, -jnp.inf)
        l_ref[...] = jnp.zeros_like(l_ref)

    logits = (jnp.dot(xn_ref[...], w_ref[...], preferred_element_type=jnp.float32)
              + b_ref[...].astype(jnp.float32))

    @pl.when(p == 0)
    def _():
        m_prev = m_ref[...]
        m_new = jnp.maximum(m_prev, jnp.max(logits, axis=-1, keepdims=True))
        l_ref[...] = (l_ref[...] * jnp.exp(m_prev - m_new)
                      + jnp.sum(jnp.exp(logits - m_new), axis=-1, keepdims=True))
        m_ref[...] = m_new

    @pl.when(p == 1)
    def _():
        lse = m_ref[...] + jnp.log(l_ref[...])
        o_ref[...] = (logits - lse).astype(o_ref.dtype)


# ---------------------------------------------------------------------------
# Wrapper
# ---------------------------------------------------------------------------
def generator_forward(x, w, b, gamma=None, beta=None, *, T=1.0, add_norm=False,
                      eps=1e-6, tm=None, tv=512, out_dtype=jnp.float32,
                      mode="auto", single_buffer_params=True,
                      vmem_budget_bytes=None, vmem_limit_bytes=None):
    """x: (B, S, D); w: (D, V); b: (V,); gamma/beta: (D,). Returns (B, S, V) log-probs.

    out_dtype=jnp.bfloat16 is the recommended production setting (the kernel is
    output-writeback bound); the default stays f32 for exact parity.
    """
    B, S, D = x.shape
    Din, V = w.shape
    assert Din == D
    N = B * S
    inv_T = 1.0 / float(T)

    x_item = x.dtype.itemsize
    w_item = w.dtype.itemsize
    out_item = jnp.dtype(out_dtype).itemsize
    if vmem_budget_bytes is None:
        vmem_budget_bytes = _default_vmem_budget()

    # Row tile: big tiles amortize the ~0.35us/step grid overhead and fill the
    # MXU; clamp / round for small N and keep it a multiple of 8 sublanes.
    def _clamp_tm(t):
        t = max(8, min(int(t), _round_up(N, 8)))
        return _round_up(t, 8)

    req_tm = 256 if tm is None else int(tm)
    tm_eff = _clamp_tm(req_tm)

    # Choose flat vs V-tiled from the per-TC VMEM budget; try tm=128 before
    # giving up on the flat kernel (the v5e-friendly fallback).
    V128 = _round_up(V, 128)
    if mode == "auto":
        if _flat_vmem_bytes(tm_eff, D, V128, x_item, w_item, out_item,
                            single_buffer_params) <= vmem_budget_bytes:
            mode = "flat"
        else:
            tm_small = _clamp_tm(min(128, req_tm))
            if _flat_vmem_bytes(tm_small, D, V128, x_item, w_item, out_item,
                                single_buffer_params) <= vmem_budget_bytes:
                mode, tm_eff = "flat", tm_small
            else:
                mode = "vtile"
    assert mode in ("flat", "vtile")

    # Fold 1/T into the tiny constant params once, outside the hot loop.
    if add_norm:
        assert gamma is not None and beta is not None
        g2 = (gamma.astype(jnp.float32) * inv_T).reshape(1, D).astype(gamma.dtype)
        beta2 = (beta.astype(jnp.float32) * inv_T).reshape(1, D).astype(beta.dtype)
    else:
        g2 = jnp.ones((1, D), x.dtype)
        beta2 = jnp.zeros((1, D), x.dtype)

    # Pad the vocab (lane) dim to a multiple of 128 (lane-dense stores); padded
    # lanes get a huge negative bias so they vanish from the softmax.
    if mode == "vtile":
        tv_eff = max(128, _round_up(min(int(tv), max(V128, 128)), 128))
        V_pad = _round_up(V, tv_eff)
    else:
        tv_eff = None
        V_pad = V128
    w_p = w if V_pad == V else jnp.pad(w, ((0, 0), (0, V_pad - V)))
    b_f32 = b.astype(jnp.float32) * inv_T
    if V_pad != V:
        b_f32 = jnp.pad(b_f32, (0, V_pad - V), constant_values=_MASK)
    b2 = b_f32.reshape(1, V_pad).astype(b.dtype)

    # Pad rows to a multiple of the row tile.
    N_pad = _round_up(N, tm_eff)
    x2 = x.reshape(N, D)
    if N_pad != N:
        x2 = jnp.pad(x2, ((0, N_pad - N), (0, 0)))

    def _const_spec(shape, index_map):
        # Constant blocks: the block index never changes across the grid, so
        # single-buffer them (halves their VMEM footprint).
        if single_buffer_params:
            return pl.BlockSpec(shape, index_map, pipeline_mode=pl.Buffered(1))
        return pl.BlockSpec(shape, index_map)

    if mode == "flat":
        grid = (N_pad // tm_eff,)
        kernel = functools.partial(_generator_flat_kernel, inv_T=inv_T,
                                   eps=float(eps), add_norm=bool(add_norm))
        est = _flat_vmem_bytes(tm_eff, D, V_pad, x_item, w_item, out_item,
                               single_buffer_params)
        cost = pl.CostEstimate(
            flops=2 * N_pad * D * V_pad,
            transcendentals=N_pad * (V_pad + 2),   # exp + log + sqrt/recip
            bytes_accessed=(N_pad * D * x_item + D * V_pad * w_item
                            + N_pad * V_pad * out_item),
        )
        in_specs = [
            pl.BlockSpec((tm_eff, D), lambda i: (i, 0)),     # x rows (pipelined)
            _const_spec((D, V_pad), lambda i: (0, 0)),       # weight (resident)
            _const_spec((1, V_pad), lambda i: (0, 0)),       # bias / T
            _const_spec((1, D), lambda i: (0, 0)),           # gamma / T
            _const_spec((1, D), lambda i: (0, 0)),           # beta / T
        ]
        out_specs = pl.BlockSpec((tm_eff, V_pad), lambda i: (i, 0))
        dims = ("parallel",)
        scratch = []
    else:
        grid = (N_pad // tm_eff, 2, V_pad // tv_eff)
        kernel = functools.partial(_generator_vtiled_kernel, inv_T=inv_T,
                                   eps=float(eps), add_norm=bool(add_norm))
        est = _vtiled_vmem_bytes(tm_eff, tv_eff, D, x_item, w_item, out_item)
        cost = pl.CostEstimate(
            flops=4 * N_pad * D * V_pad,                     # two passes over V
            transcendentals=2 * N_pad * (V_pad + 2),
            bytes_accessed=(N_pad * D * x_item
                            + 2 * (N_pad // tm_eff) * D * V_pad * w_item
                            + N_pad * V_pad * out_item),
        )
        in_specs = [
            pl.BlockSpec((tm_eff, D), lambda i, p, j: (i, 0)),   # resident per row tile
            pl.BlockSpec((D, tv_eff), lambda i, p, j: (0, j)),   # streamed weight tiles
            pl.BlockSpec((1, tv_eff), lambda i, p, j: (0, j)),   # streamed bias tiles
            _const_spec((1, D), lambda i, p, j: (0, 0)),
            _const_spec((1, D), lambda i, p, j: (0, 0)),
        ]
        # Pass 0 maps every j to block (i, 0) -> each output block's visits are
        # consecutive and only pass-1 data is ever written back.
        out_specs = pl.BlockSpec((tm_eff, tv_eff), lambda i, p, j: (i, j * p))
        dims = ("parallel", "arbitrary", "arbitrary")
        scratch = [
            pltpu.VMEM((tm_eff, D), w.dtype),       # normalized / scaled x cache
            pltpu.VMEM((tm_eff, 1), jnp.float32),   # running max
            pltpu.VMEM((tm_eff, 1), jnp.float32),   # running sum-exp
        ]

    if vmem_limit_bytes is None:
        # Raise the scoped-VMEM limit above the 16/32 MiB chip defaults when the
        # estimate demands it (leave headroom for pipeline internals).
        vmem_limit_bytes = int(min(max(est * 3 // 2 + (4 << 20), 32 << 20), 100 << 20))

    out = pl.pallas_call(
        kernel,
        out_shape=jax.ShapeDtypeStruct((N_pad, V_pad), out_dtype),
        grid_spec=pltpu.PrefetchScalarGridSpec(
            num_scalar_prefetch=0,
            grid=grid,
            in_specs=in_specs,
            out_specs=out_specs,
            scratch_shapes=scratch,
        ),
        compiler_params=pltpu.CompilerParams(
            dimension_semantics=dims,
            vmem_limit_bytes=vmem_limit_bytes,
        ),
        cost_estimate=cost,
    )(x2, w_p, b2, g2, beta2)

    if N_pad != N or V_pad != V:
        out = out[:N, :V]
    return out.reshape(B, S, V)


# ---------------------------------------------------------------------------
# Pure-JAX reference (mirrors the PyTorch module)
# ---------------------------------------------------------------------------
def _reference(x, w, b, gamma=None, beta=None, *, T=1.0, add_norm=False, eps=1e-6):
    x = x.astype(jnp.float32)
    if add_norm:
        d = x.shape[-1]
        mean = jnp.mean(x, axis=-1, keepdims=True)
        centered = x - mean
        std = jnp.sqrt(jnp.sum(centered * centered, axis=-1, keepdims=True) / (d - 1))
        x = gamma * centered / (std + eps) + beta
    logits = (x @ w + b) / T
    return jax.nn.log_softmax(logits, axis=-1)


if __name__ == "__main__":
    # Small shapes consistent with the module: d_model=32, batch=2, seq=8.
    # vocab=250 is deliberately NOT a multiple of 128 to exercise lane padding.
    B, S, D, V = 2, 8, 32, 250
    key = jax.random.PRNGKey(0)
    kx, kw, kb, kg, kbt = jax.random.split(key, 5)

    x = jax.random.normal(kx, (B, S, D), dtype=jnp.float32)
    bound = 1.0 / (D ** 0.5)
    w = jax.random.uniform(kw, (D, V), minval=-bound, maxval=bound, dtype=jnp.float32)
    b = jax.random.uniform(kb, (V,), minval=-bound, maxval=bound, dtype=jnp.float32)
    gamma = jnp.ones((D,), jnp.float32) + 0.01 * jax.random.normal(kg, (D,), jnp.float32)
    beta = 0.01 * jax.random.normal(kbt, (D,), jnp.float32)

    # 1) Flat kernel, add_norm=True, T=1 (f32 parity with the PyTorch module).
    out1 = jax.block_until_ready(
        generator_forward(x, w, b, gamma, beta, T=1.0, add_norm=True))
    ref1 = _reference(x, w, b, gamma, beta, T=1.0, add_norm=True)
    assert out1.shape == (B, S, V)
    err1 = float(jnp.max(jnp.abs(out1 - ref1)))
    assert err1 < 1e-4, f"flat/add_norm max abs error {err1}"
    psum1 = float(jnp.max(jnp.abs(jnp.sum(jnp.exp(out1), axis=-1) - 1.0)))
    assert psum1 < 1e-4, f"flat/add_norm prob-sum error {psum1}"

    # 2) Flat kernel, add_norm=False (module default), T != 1 (folded scale).
    out2 = jax.block_until_ready(generator_forward(x, w, b, T=1.3, add_norm=False))
    ref2 = _reference(x, w, b, T=1.3, add_norm=False)
    err2 = float(jnp.max(jnp.abs(out2 - ref2)))
    assert err2 < 1e-4, f"flat/no-norm max abs error {err2}"

    # 3) V-tiled two-pass online-log-softmax kernel (the production-vocab path),
    #    forced at small shapes with tv=128 to validate streaming + masking.
    out3 = jax.block_until_ready(
        generator_forward(x, w, b, gamma, beta, T=1.3, add_norm=True,
                          mode="vtile", tv=128))
    ref3 = _reference(x, w, b, gamma, beta, T=1.3, add_norm=True)
    err3 = float(jnp.max(jnp.abs(out3 - ref3)))
    assert err3 < 1e-4, f"vtile max abs error {err3}"

    # 4) bf16 output (production setting: halves the dominant HBM writeback).
    out4 = jax.block_until_ready(
        generator_forward(x, w, b, T=1.0, add_norm=False, out_dtype=jnp.bfloat16))
    ref4 = _reference(x, w, b, T=1.0, add_norm=False)
    assert out4.dtype == jnp.bfloat16
    err4 = float(jnp.max(jnp.abs(out4.astype(jnp.float32) - ref4)))
    assert err4 < 8e-2, f"bf16-out max abs error {err4}"

    print("KERNEL_OK")
</pallas_src>

<mosaic_0001>
module attributes {stable_mosaic.version = 11 : i64} {
  func.func @_generator_flat_kernel(%arg0: i32, %arg1: memref<16x32xf32, #tpu.memory_space<vmem>>, %arg2: memref<32x256xf32, #tpu.memory_space<vmem>>, %arg3: memref<1x256xf32, #tpu.memory_space<vmem>>, %arg4: memref<1x32xf32, #tpu.memory_space<vmem>>, %arg5: memref<1x32xf32, #tpu.memory_space<vmem>>, %arg6: memref<16x256xf32, #tpu.memory_space<vmem>>) attributes {dimension_semantics = [#tpu.dimension_semantics<parallel>], iteration_bounds = array<i64: 1>, scalar_prefetch = 0 : i64, scratch_operands = 0 : i64, tpu.core_type = #tpu.core_type<tc>, window_params = [{transform_indices = @transform_0, window_bounds = array<i64: 16, 32>}, {pipeline_mode = #tpu.pipeline_mode<synchronous>, transform_indices = @transform_1, window_bounds = array<i64: 32, 256>}, {pipeline_mode = #tpu.pipeline_mode<synchronous>, transform_indices = @transform_2, window_bounds = array<i64: 1, 256>}, {pipeline_mode = #tpu.pipeline_mode<synchronous>, transform_indices = @transform_3, window_bounds = array<i64: 1, 32>}, {pipeline_mode = #tpu.pipeline_mode<synchronous>, transform_indices = @transform_4, window_bounds = array<i64: 1, 32>}, {transform_indices = @transform_5, window_bounds = array<i64: 16, 256>}]} {
    %c0 = arith.constant 0 : index
    %c0_0 = arith.constant 0 : index
    %0 = vector.load %arg2[%c0, %c0_0] : memref<32x256xf32, #tpu.memory_space<vmem>>, vector<32x256xf32>
    %c0_1 = arith.constant 0 : index
    %c0_2 = arith.constant 0 : index
    %1 = vector.load %arg3[%c0_1, %c0_2] : memref<1x256xf32, #tpu.memory_space<vmem>>, vector<1x256xf32>
    %c0_3 = arith.constant 0 : index
    %c0_4 = arith.constant 0 : index
    %2 = vector.load %arg1[%c0_3, %c0_4] : memref<16x32xf32, #tpu.memory_space<vmem>>, vector<16x32xf32>
    %c0_5 = arith.constant 0 : index
    %c0_6 = arith.constant 0 : index
    %3 = vector.load %arg4[%c0_5, %c0_6] : memref<1x32xf32, #tpu.memory_space<vmem>>, vector<1x32xf32>
    %c0_7 = arith.constant 0 : index
    %c0_8 = arith.constant 0 : index
    %4 = vector.load %arg5[%c0_7, %c0_8] : memref<1x32xf32, #tpu.memory_space<vmem>>, vector<1x32xf32>
    %cst = arith.constant dense<0.000000e+00> : vector<16xf32>
    %5 = vector.multi_reduction <add>, %2, %cst [1] : vector<16x32xf32> to vector<16xf32>
    %6 = vector.shape_cast %5 : vector<16xf32> to vector<16x1xf32>
    %cst_9 = arith.constant 3.200000e+01 : f32
    %7 = vector.broadcast %cst_9 : f32 to vector<16x1xf32>
    %8 = arith.divf %6, %7 : vector<16x1xf32>
    %9 = vector.broadcast %8 : vector<16x1xf32> to vector<16x32xf32>
    %10 = arith.subf %2, %9 : vector<16x32xf32>
    %11 = arith.mulf %10, %10 : vector<16x32xf32>
    %cst_10 = arith.constant dense<0.000000e+00> : vector<16xf32>
    %12 = vector.multi_reduction <add>, %11, %cst_10 [1] : vector<16x32xf32> to vector<16xf32>
    %13 = vector.shape_cast %12 : vector<16xf32> to vector<16x1xf32>
    %cst_11 = arith.constant 0.0322580636 : f32
    %14 = vector.broadcast %cst_11 : f32 to vector<16x1xf32>
    %15 = arith.mulf %13, %14 : vector<16x1xf32>
    %16 = math.sqrt %15 : vector<16x1xf32>
    %cst_12 = arith.constant 9.99999997E-7 : f32
    %17 = vector.broadcast %cst_12 : f32 to vector<16x1xf32>
    %18 = arith.addf %16, %17 : vector<16x1xf32>
    %19 = tpu.reciprocal %18 : vector<16x1xf32> -> vector<16x1xf32>
    %20 = vector.broadcast %3 : vector<1x32xf32> to vector<16x32xf32>
    %21 = arith.mulf %20, %10 : vector<16x32xf32>
    %22 = vector.broadcast %19 : vector<16x1xf32> to vector<16x32xf32>
    %23 = arith.mulf %21, %22 : vector<16x32xf32>
    %24 = vector.broadcast %4 : vector<1x32xf32> to vector<16x32xf32>
    %25 = arith.addf %23, %24 : vector<16x32xf32>
    %cst_13 = arith.constant dense<0.000000e+00> : vector<16x256xf32>
    %26 = tpu.matmul %25, %0, %cst_13 {dimension_numbers = #tpu.dot_dimension_numbers<[1], [0], [0], [1], [0, 0, 1, 1], [], []>} : vector<16x32xf32>, vector<32x256xf32>, vector<16x256xf32> -> vector<16x256xf32>
    %27 = vector.broadcast %1 : vector<1x256xf32> to vector<16x256xf32>
    %28 = arith.addf %26, %27 : vector<16x256xf32>
    %cst_14 = arith.constant dense<0xFF800000> : vector<16xf32>
    %29 = vector.multi_reduction <maximumf>, %28, %cst_14 [1] : vector<16x256xf32> to vector<16xf32>
    %30 = vector.shape_cast %29 : vector<16xf32> to vector<16x1xf32>
    %31 = vector.broadcast %30 : vector<16x1xf32> to vector<16x256xf32>
    %32 = arith.subf %28, %31 : vector<16x256xf32>
    %33 = math.exp %32 : vector<16x256xf32>
    %cst_15 = arith.constant dense<0.000000e+00> : vector<16xf32>
    %34 = vector.multi_reduction <add>, %33, %cst_15 [1] : vector<16x256xf32> to vector<16xf32>
    %35 = vector.shape_cast %34 : vector<16xf32> to vector<16x1xf32>
    %36 = math.log %35 : vector<16x1xf32>
    %37 = vector.broadcast %36 : vector<16x1xf32> to vector<16x256xf32>
    %38 = arith.subf %32, %37 : vector<16x256xf32>
    %c0_16 = arith.constant 0 : index
    %c0_17 = arith.constant 0 : index
    %39 = vector.load %arg6[%c0_16, %c0_17] : memref<16x256xf32, #tpu.memory_space<vmem>>, vector<16x256xf32>
    tpu.vector_store %arg6[%c0_16, %c0_17], %38 {strides = array<i32>} : memref<16x256xf32, #tpu.memory_space<vmem>>, vector<16x256xf32>,
    return
  }
  func.func @transform_0(%arg0: i32) -> (i32, i32) {
    %c0_i32 = arith.constant 0 : i32
    %c0_i32_0 = arith.constant 0 : i32
    return %arg0, %c0_i32 : i32, i32
  }
  func.func @transform_1(%arg0: i32) -> (i32, i32) {
    %c0_i32 = arith.constant 0 : i32
    %c0_i32_0 = arith.constant 0 : i32
    %c0_i32_1 = arith.constant 0 : i32
    return %c0_i32, %c0_i32_0 : i32, i32
  }
  func.func @transform_2(%arg0: i32) -> (i32, i32) {
    %c0_i32 = arith.constant 0 : i32
    %c0_i32_0 = arith.constant 0 : i32
    %c0_i32_1 = arith.constant 0 : i32
    return %c0_i32, %c0_i32_0 : i32, i32
  }
  func.func @transform_3(%arg0: i32) -> (i32, i32) {
    %c0_i32 = arith.constant 0 : i32
    %c0_i32_0 = arith.constant 0 : i32
    %c0_i32_1 = arith.constant 0 : i32
    return %c0_i32, %c0_i32_0 : i32, i32
  }
  func.func @transform_4(%arg0: i32) -> (i32, i32) {
    %c0_i32 = arith.constant 0 : i32
    %c0_i32_0 = arith.constant 0 : i32
    %c0_i32_1 = arith.constant 0 : i32
    return %c0_i32, %c0_i32_0 : i32, i32
  }
  func.func @transform_5(%arg0: i32) -> (i32, i32) {
    %c0_i32 = arith.constant 0 : i32
    %c0_i32_0 = arith.constant 0 : i32
    return %arg0, %c0_i32 : i32, i32
  }
}

</mosaic_0001>

<bundles_post_ra>
// kernel: tpu_custom_call.1
= control target key start
LH: loop header
LB: loop body
LE: loop exit
PB: predicated region body
PF: predicated region fallthrough
CT: control target
= control target key end

     0   :  { %10 = vsyncpa [#allocation3], 0  ;;  %s514_s0 = inlined_call_operand.hbm [shape: f32[16,32], index: 0, kind: input, shape index: {}]   ;;  %s515_s1 = inlined_call_operand.hbm [shape: f32[32,256], index: 1, kind: input, shape index: {}]   ;;  %s516_s2 = inlined_call_operand.hbm [shape: f32[1,256], index: 2, kind: input, shape index: {}]   ;;  %s517_s3 = inlined_call_operand.vmem [shape: f32[1,32], index: 3, kind: input, shape index: {}]   ;;  %s518_s4 = inlined_call_operand.vmem [shape: f32[1,32], index: 4, kind: input, shape index: {}]   ;;  %s519_s5 = inlined_call_operand.hbm [shape: f32[16,256], index: 5, kind: output, shape index: {}]  }
   0x1   :  { %11 = vsyncpa [#allocation6], 0  ;;  %s30_s20 = sshll.u32 %s515_s1, 4  ;;  %s31_s20 = int_to_ptr.hbm [resolvable:$true] %s30_s20 }
   0x2   :  { %12 = vsyncpa [#allocation4], 0  ;;  %s433_s21 = smov [#allocation5]   ;;  %s17_s25 = sshll.u32 %s514_s0, 4  ;;  %s18_s25 = int_to_ptr.hbm [resolvable:$true] %s17_s25 }
   0x3   :  { %s32_s22 = sshll.u32 %s433_s21, 4  ;;  %s434_s26 = smov 256   ;;  %s33_s22 = int_to_ptr.vmem [resolvable:$true] %s32_s22 }
   0x4   :  { %s435_s27 = smov 16   ;;  %s436_s28 = smov [#allocation2]  }
   0x5   :  { %38 = dma.hbm_to_vmem [thread:$0]  %s31_s20, 1024, %s33_s22, [#allocation6], %s434_s26, %s434_s26, %s435_s27  }
   0x6   :  { %s19_s29 = sshll.u32 %s436_s28, 4  ;;  %s437_s1 = smov 128   ;;  %s20_s29 = int_to_ptr.vmem [resolvable:$true] %s19_s29 }
   0x7   :  { %s438_s30 = smov 8   ;;  %s44_s8 = sshll.u32 %s516_s2, 4  ;;  %s45_s8 = int_to_ptr.hbm [resolvable:$true] %s44_s8 }
   0x8   :  { %25 = dma.hbm_to_vmem [thread:$0]  %s18_s25, 256, %s20_s29, [#allocation3], %s437_s1, %s437_s1, %s438_s30  }
   0x9   :  { %s439_s9 = smov [#allocation7]  }
   0xa   :  { %s46_s0 = sshll.u32 %s439_s9, 4  ;;  %s47_s0 = int_to_ptr.vmem [resolvable:$true] %s46_s0 }
   0xb   :  { %49 = dma.hbm_to_vmem [thread:$0]  %s45_s8, 32, %s47_s0, [#allocation6]  }
   0xc   :  { %427 = dma.done.wait [#allocation3], 256  }
   0xd   :  { %428 = vsyncadd [#allocation3], 4294967040 }
   0xe   :  { %429 = dma.done.wait [#allocation6], 1056  }
   0xf   :  { %430 = vsyncadd [#allocation6], 4294966240  ;;  %vm79_vm0 = vcmask 261120   ;;  %v76_v0 = vld [vmem:[#allocation2 + $0x8] sm:$0xff]  ;;  %v75_v2 = vld [vmem:[#allocation2] sm:$0xff]  ;;  %v440_v4 = vmov 32.0  }
  0x10   :  { %v83_v1 = vsel %vm79_vm0, %v76_v0, 0.0  ;;  %v80_v3 = vsel %vm79_vm0, %v75_v2, 0.0  ;;  %309 = vrcp.f32 %v440_v4  ;;  %v72_v21 = vld [vmem:[#allocation5 + $0x30] sm:$0xff]  ;;  %v73_v22 = vld [vmem:[#allocation5 + $0x38] sm:$0xff]  ;;  %v70_v23 = vld [vmem:[#allocation5 + $0x20] sm:$0xff]  ;;  %s272_s15 = sshll.u32 %s519_s5, 4  ;;  %s273_s15 = int_to_ptr.hbm [resolvable:$true] %s272_s15 }
  0x11   :  { %84 = vadd.xlane.f32.xlu0 %v83_v1  ;;  %290 = vmatpush.msra.mxu2 %v72_v21  ;;  %v71_v24 = vld [vmem:[#allocation5 + $0x28] sm:$0xff]  ;;  %v68_v25 = vld [vmem:[#allocation5 + $0x10] sm:$0xff]  ;;  %v69_v26 = vld [vmem:[#allocation5 + $0x18] sm:$0xff] }
  0x12   :  { %294 = vmatpush.msra.mxu3 %v73_v22  ;;  %196 = vmatpush.msra.mxu0 %v72_v21  ;;  %v66_v28 = vld [vmem:[#allocation5] sm:$0xff]  ;;  %v67_v29 = vld [vmem:[#allocation5 + $0x8] sm:$0xff]  ;;  %v307_v59 = vld [vmem:[%s517_s3] ss:$0 sm:$0xff]  ;;  %s441_s3 = smov [#allocation8]  }
  0x13   :  { %219 = vmatpush.msra.mxu1 %v73_v22  ;;  %291 = vmatpush.msra.mxu2 %v70_v23 }
  0x14   :  { %295 = vmatpush.msra.mxu3 %v71_v24  ;;  %197 = vmatpush.msra.mxu0 %v70_v23 }
  0x15   :  { %220 = vmatpush.msra.mxu1 %v71_v24  ;;  %292 = vmatpush.msra.mxu2 %v68_v25 }
  0x16   :  { %v310_v5 = vpop.eup %309  ;;  %296 = vmatpush.msra.mxu3 %v69_v26  ;;  %198 = vmatpush.msra.mxu0 %v68_v25 }
  0x17   :  { %v87_v6 = vmul.f32 32.0, %v310_v5  ;;  %vm91_vm1 = vweird.f32 %v310_v5  ;;  %221 = vmatpush.msra.mxu1 %v69_v26  ;;  %293 = vmatpush.msra.mxu2 %v66_v28 }
  0x18   :  { %297 = vmatpush.msra.mxu3 %v67_v29  ;;  %199 = vmatpush.msra.mxu0 %v66_v28 }
  0x19   :  { %81 = vadd.xlane.f32.xlu0 %v80_v3  ;;  %v88_v7 = vsub.f32 1.0, %v87_v6  ;;  %222 = vmatpush.msra.mxu1 %v67_v29  ;;  %v308_v3 = vld [vmem:[%s518_s4] ss:$0 sm:$0xff]  ;;  %s270_s4 = sshll.u32 %s441_s3, 4  ;;  %s271_s4 = int_to_ptr.vmem [resolvable:$true] %s270_s4 }
  0x1b   :  { %v89_v8 = vmul.f32 %v310_v5, %v88_v7 }
  0x1d   :  { %v90_v9 = vadd.f32 %v310_v5, %v89_v8 }
  0x1f   :  { %v92_v10 = vsel %vm91_vm1, %v310_v5, %v90_v9 }
  0x84   :  { %v85_v11 = vpop.xlane.xlu0 %84 }
  0x85   :  { %v94_v12 = vmul.f32 %v92_v10, %v85_v11 }
  0x87   :  { %v486_v13 = vsub.f32 %v76_v0, %v94_v12 }
  0x89   :  { %v98_v14 = vmul.f32 %v486_v13, %v486_v13  ;;  %v165_v1 = vmul.f32 %v307_v59, %v486_v13 }
  0x8b   :  { %v102_v15 = vsel %vm79_vm0, %v98_v14, 0.0 }
  0x8c   :  { %103 = vadd.xlane.f32.xlu1 %v102_v15  ;;  %v82_v16 = vpop.xlane.xlu0 %81 }
  0x8d   :  { %v93_v17 = vmul.f32 %v92_v10, %v82_v16 }
  0x8f   :  { %v491_v18 = vsub.f32 %v75_v2, %v93_v17 }
  0x91   :  { %v97_v19 = vmul.f32 %v491_v18, %v491_v18  ;;  %v164_v14 = vmul.f32 %v307_v59, %v491_v18 }
  0x93   :  { %v99_v20 = vsel %vm79_vm0, %v97_v19, 0.0 }
  0x94   :  { %100 = vadd.xlane.f32.xlu1 %v99_v20  ;;  %v74_v20 = vld [vmem:[#allocation7] sm:$0x3] }
  0x95   :  { %v174_v21 = vperm.slane %v74_v20, 0  ;;  %v175_v22 = vperm.slane %v74_v20, 1 }
  0xff   :  { %v104_v27 = vpop.xlane.xlu1 %103 }
 0x100   :  { %v106_v30 = vmul.f32 0.032258064, %v104_v27 }
 0x102   :  { %311 = vrsqrt.f32 %v106_v30  ;;  %vm126_vm2 = vcmp.eq.f32.partialorder %v106_v30, inf  ;;  %v129_v43 = vand.u32 2147483648, %v106_v30  ;;  %vm128_vm3 = vcmp.eq.f32.partialorder %v106_v30, 0.0 }
 0x107   :  { %v101_v31 = vpop.xlane.xlu1 %100 }
 0x108   :  { %v312_v32 = vpop.eup %311  ;;  %v105_v33 = vmul.f32 0.032258064, %v101_v31 }
 0x109   :  { %v120_v34 = vmul.f32 %v312_v32, %v106_v30 }
 0x10a   :  { %313 = vrsqrt.f32 %v105_v33  ;;  %vm114_vm4 = vcmp.eq.f32.partialorder %v105_v33, inf  ;;  %v117_v51 = vand.u32 2147483648, %v105_v33  ;;  %vm116_vm5 = vcmp.eq.f32.partialorder %v105_v33, 0.0 }
 0x10b   :  { %v121_v35 = vmul.f32 %v312_v32, %v120_v34 }
 0x10d   :  { %v122_v36 = vmul.f32 0.5, %v121_v35 }
 0x10f   :  { %v123_v37 = vsub.f32 1.5, %v122_v36 }
 0x110   :  { %v314_v38 = vpop.eup %313 }
 0x111   :  { %v124_v39 = vmul.f32 %v312_v32, %v123_v37  ;;  %v108_v40 = vmul.f32 %v314_v38, %v105_v33 }
 0x113   :  { %v125_v41 = vmul.f32 %v124_v39, %v106_v30  ;;  %v109_v42 = vmul.f32 %v314_v38, %v108_v40 }
 0x115   :  { %v110_v44 = vmul.f32 0.5, %v109_v42  ;;  %v127_v45 = vsel %vm126_vm2, %v106_v30, %v125_v41 }
 0x116   :  { %v130_v46 = vsel %vm128_vm3, %v129_v43, %v127_v45 }
 0x117   :  { %v111_v47 = vsub.f32 1.5, %v110_v44  ;;  %v132_v48 = vadd.f32 1e-06, %v130_v46 }
 0x119   :  { %v112_v49 = vmul.f32 %v314_v38, %v111_v47  ;;  %315 = vrcp.f32 %v132_v48  ;;  %v158_v58 = vand.u32 2147483648, %v132_v48  ;;  %v156_v61 = vand.u32 2147483647, %v132_v48 }
 0x11a   :  { %vm152_vm7 = vweird.f32 %v132_v48 }
 0x11b   :  { %v113_v50 = vmul.f32 %v112_v49, %v105_v33  ;;  %v159_v0 = vor.u32 1.1754944e-38, %v158_v58  ;;  %vm157_vm9 = vcmp.eq.f32.partialorder %v156_v61, 8.507059e+37 }
 0x11d   :  { %v115_v52 = vsel %vm114_vm4, %v105_v33, %v113_v50 }
 0x11e   :  { %v118_v53 = vsel %vm116_vm5, %v117_v51, %v115_v52 }
 0x11f   :  { %v316_v54 = vpop.eup %315  ;;  %v131_v55 = vadd.f32 1e-06, %v118_v53 }
 0x120   :  { %v148_v56 = vmul.f32 %v316_v54, %v132_v48  ;;  %vm153_vm6 = vweird.f32 %v316_v54 }
 0x121   :  { %317 = vrcp.f32 %v131_v55  ;;  %vm154_vm8 = vmor %vm152_vm7, %vm153_vm6  ;;  %v144_v8 = vand.u32 2147483648, %v131_v55  ;;  %v142_v11 = vand.u32 2147483647, %v131_v55  ;;  %vm138_vm11 = vweird.f32 %v131_v55 }
 0x122   :  { %v149_v57 = vsub.f32 1.0, %v148_v56 }
 0x123   :  { %v145_v13 = vor.u32 1.1754944e-38, %v144_v8  ;;  %vm143_vm13 = vcmp.eq.f32.partialorder %v142_v11, 8.507059e+37 }
 0x124   :  { %v150_v60 = vmul.f32 %v316_v54, %v149_v57 }
 0x126   :  { %v151_v62 = vadd.f32 %v316_v54, %v150_v60 }
 0x127   :  { %v318_v63 = vpop.eup %317 }
 0x128   :  { %v155_v2 = vsel %vm154_vm8, %v316_v54, %v151_v62  ;;  %v134_v4 = vmul.f32 %v318_v63, %v131_v55  ;;  %vm139_vm10 = vweird.f32 %v318_v63 }
 0x129   :  { %v160_v5 = vsel %vm157_vm9, %v159_v0, %v155_v2  ;;  %vm140_vm12 = vmor %vm138_vm11, %vm139_vm10 }
 0x12a   :  { %v167_v6 = vmul.f32 %v165_v1, %v160_v5  ;;  %v135_v7 = vsub.f32 1.0, %v134_v4 }
 0x12c   :  { %v172_v9 = vadd.f32 %v308_v3, %v167_v6  ;;  %v136_v10 = vmul.f32 %v318_v63, %v135_v7 }
 0x12e   :  { %287 = vmatmul.msk.f32.vlgmr.msra.gmra.mxu2 %vm79_vm0, %v172_v9  ;;  %289 = vmatmul.msk.f32.vlgmr.msra.gmra.mxu3 %vm79_vm0, %v172_v9  ;;  %v137_v12 = vadd.f32 %v318_v63, %v136_v10 }
 0x130   :  { %v141_v15 = vsel %vm140_vm12, %v318_v63, %v137_v12 }
 0x131   :  { %v146_v16 = vsel %vm143_vm13, %v145_v13, %v141_v15 }
 0x132   :  { %v166_v17 = vmul.f32 %v164_v14, %v146_v16 }
 0x134   :  { %v171_v19 = vadd.f32 %v308_v3, %v166_v17 }
 0x136   :  { %286 = vmatmul.msk.f32.vlgmr.msra.gmra.mxu0 %vm79_vm0, %v171_v19  ;;  %288 = vmatmul.msk.f32.vlgmr.msra.gmra.mxu1 %vm79_vm0, %v171_v19 }
 0x1b1   :  { %v204_v28 = vpop.f32.mrf.mxu2  ;;  %v227_v29 = vpop.f32.mrf.mxu3 }
 0x1b2   :  { %v205_v18 = vadd.f32 %v204_v28, %v174_v21  ;;  %v228_v30 = vadd.f32 %v227_v29, %v175_v22 }
 0x1b3   :  { %v201_v23 = vpop.f32.mrf.mxu0  ;;  %v224_v24 = vpop.f32.mrf.mxu1 }
 0x1b4   :  { %v202_v25 = vadd.f32 %v201_v23, %v174_v21  ;;  %v225_v26 = vadd.f32 %v224_v24, %v175_v22  ;;  %v233_v31 = vmax.f32 %v205_v18, %v228_v30 }
 0x1b6   :  { %v230_v27 = vmax.f32 %v202_v25, %v225_v26 }
 0x1b8   :  { %231 = vmax.xlane.f32.xlu2 %v230_v27 }
 0x1c0   :  { %234 = vmax.xlane.f32.xlu2 %v233_v31 }
 0x22b   :  { %v232_v32 = vpop.xlane.xlu2 %231 }
 0x22c   :  { %v236_v33 = vsub.f32 %v202_v25, %v232_v32  ;;  %v237_v34 = vsub.f32 %v225_v26, %v232_v32 }
 0x22e   :  { %v240_v35 = vmul.f32 1.442695, %v236_v33  ;;  %v242_v36 = vmul.f32 1.442695, %v237_v34 }
 0x230   :  { %319 = vpow2.f32 %v240_v35 }
 0x231   :  { %321 = vpow2.f32 %v242_v36 }
 0x233   :  { %v235_v37 = vpop.xlane.xlu2 %234 }
 0x234   :  { %v238_v38 = vsub.f32 %v205_v18, %v235_v37  ;;  %v239_v39 = vsub.f32 %v228_v30, %v235_v37 }
 0x236   :  { %v320_v40 = vpop.eup %319  ;;  %v244_v41 = vmul.f32 1.442695, %v238_v38  ;;  %v246_v42 = vmul.f32 1.442695, %v239_v39 }
 0x237   :  { %v322_v43 = vpop.eup %321 }
 0x238   :  { %323 = vpow2.f32 %v244_v41  ;;  %v248_v44 = vadd.f32 %v322_v43, %v320_v40 }
 0x239   :  { %325 = vpow2.f32 %v246_v42 }
 0x23a   :  { %249 = vadd.xlane.f32.xlu0 %v248_v44 }
 0x23e   :  { %v324_v45 = vpop.eup %323 }
 0x23f   :  { %v326_v46 = vpop.eup %325 }
 0x240   :  { %v251_v47 = vadd.f32 %v326_v46, %v324_v45 }
 0x242   :  { %252 = vadd.xlane.f32.xlu1 %v251_v47 }
 0x2ad   :  { %v250_v48 = vpop.xlane.xlu0 %249 }
 0x2ae   :  { %327 = vlog2.f32 %v250_v48 }
 0x2b4   :  { %v328_v49 = vpop.eup %327 }
 0x2b5   :  { %v255_v50 = vmul.f32 0.6931472, %v328_v49  ;;  %v253_v51 = vpop.xlane.xlu1 %252 }
 0x2b6   :  { %329 = vlog2.f32 %v253_v51 }
 0x2b7   :  { %v258_v52 = vsub.f32 %v236_v33, %v255_v50  ;;  %v259_v53 = vsub.f32 %v237_v34, %v255_v50 }
 0x2b9   :  { %262 = vst [vmem:[#allocation8] sm:$0xff] %v258_v52 }
 0x2ba   :  { %263 = vst [vmem:[#allocation8 + $0x8] sm:$0xff] %v259_v53 }
 0x2bc   :  { %v330_v54 = vpop.eup %329 }
 0x2bd   :  { %v257_v55 = vmul.f32 0.6931472, %v330_v54 }
 0x2bf   :  { %v260_v56 = vsub.f32 %v238_v38, %v257_v55  ;;  %v261_v57 = vsub.f32 %v239_v39, %v257_v55 }
 0x2c1   :  { %264 = vst [vmem:[#allocation8 + $0x10] sm:$0xff] %v260_v56 }
 0x2c2   :  { %265 = vst [vmem:[#allocation8 + $0x18] sm:$0xff] %v261_v57 }
 0x2c3   :  { %278 = dma.vmem_to_hbm [thread:$0]  %s271_s4, 512, %s273_s15, [#allocation4], %s434_s26, %s434_s26, %s435_s27  }
 0x2c4   :  { %431 = dma.done.wait [#allocation4], 512  }
 0x2c5   :  { %432 = vsyncadd [#allocation4], 4294966784 }
 0x2c6   :  { %283 = vsyncpa [#allocation3], 1 }
 0x2c7   :  { %284 = vsyncpa [#allocation6], 1 }
 0x2c8   :  { %285 = vsyncpa [#allocation4], 1 }

</bundles_post_ra>
